<compile_context>
chip_gen: v6e
topology: v6e:2x2x1
jax: 0.10.0
libtpu: 0.0.40
codegen_flags: <defaults>
</compile_context>

<pallas_src>
import functools
import math

import jax
import jax.numpy as jnp
from jax.experimental import pallas as pl
from jax.experimental.pallas import tpu as pltpu


# ---------------------------------------------------------------------------
# Hardware / tiling helpers
# ---------------------------------------------------------------------------
def _vmem_capacity_bytes():
    """Physical VMEM capacity (generation-aware), with a conservative fallback."""
    try:
        info = pltpu.get_tpu_info()
        cap = getattr(info, "vmem_capacity_bytes", None)
        if cap:
            return int(cap)
    except Exception:
        pass
    return 64 * 1024 * 1024  # v7x per-TensorCore VMEM (smallest current gen)


def _choose_batch_tile(B, D, vmem_budget_bytes):
    """Pick a batch tile TB for a (B, D) f32 streaming elementwise pass.

    - Whole batch as a single block only when B is tiny.
    - Otherwise a multiple of 8, at most ~half the batch (>= 2 grid tiles so
      the "parallel" axis can be sharded across v7x's two TensorCores),
    - sized so double-buffered x-in + y-out f32 tiles fit the VMEM budget,
    - and large enough (~2 MiB per input tile) to amortize the ~0.35 us
      per-grid-step overhead.
    """
    if B <= 16:
        return B
    # Double-buffered in + out: 2 * 2 * TB * D * 4 bytes <= budget.
    max_tb_vmem = max(8, vmem_budget_bytes // (16 * D))
    # Bandwidth target: >= ~2 MiB input tile (or at least 256 rows).
    target_tb = max(256, (2 * 1024 * 1024) // (4 * D))
    # Keep >= 2 grid tiles.
    half_b = max(8, ((B // 2) // 8) * 8)
    tb = min(max_tb_vmem, target_tb, half_b, 4096)
    return max(8, (tb // 8) * 8)


def _lane_dense_remap(B, D):
    """Return (m, L) such that (B, D) can be viewed as (B//m, L=m*D) with L a
    multiple of 128 (lane-dense), or None if not needed / not possible."""
    if D % 128 == 0:
        return None  # already lane-dense
    m = 128 // math.gcd(D, 128)
    if m <= 1 or B % m != 0:
        return None
    return m, m * D


# ---------------------------------------------------------------------------
# Kernel 1: data-dependent initialization (the `initialized == False` branch).
#   weight = log(1 / (std(x, axis=0, unbiased) + 1e-12))
#   bias   = mean(x, axis=0)
# Streams x over the batch grid axis.  The last (ragged) tile is masked with
# an iota compare.  Sums are accumulated on (x - shift) where shift is the
# first row, making the single-pass variance numerically stable.
# ---------------------------------------------------------------------------
def _actnorm_init_kernel(x_ref, w_ref, b_ref, shift_ref, sum_ref, sumsq_ref,
                         *, n_rows, tb):
    i = pl.program_id(0)
    x = x_ref[...]                                        # (TB, D) f32

    @pl.when(i == 0)
    def _():
        shift_ref[...] = x[0:1, :]                        # row 0 is always valid
        sum_ref[...] = jnp.zeros_like(sum_ref)
        sumsq_ref[...] = jnp.zeros_like(sumsq_ref)

    row = jax.lax.broadcasted_iota(jnp.int32, x.shape, 0) + i * tb
    valid = row < n_rows
    xc = jnp.where(valid, x - shift_ref[...], 0.0)
    sum_ref[...] += jnp.sum(xc, axis=0, keepdims=True)
    sumsq_ref[...] += jnp.sum(xc * xc, axis=0, keepdims=True)

    @pl.when(i == pl.num_programs(0) - 1)
    def _():
        n = jnp.float32(n_rows)
        mean_c = sum_ref[...] / n
        # torch.Tensor.std(0) is the unbiased estimator (ddof=1).
        var = (sumsq_ref[...] - n * mean_c * mean_c) / (n - 1.0)
        std = jnp.sqrt(jnp.maximum(var, 0.0))
        w_ref[...] = jnp.log(1.0 / (std + 1e-12))
        b_ref[...] = mean_c + shift_ref[...]


# ---------------------------------------------------------------------------
# Kernel 2: the ActNorm transform (direct / inverse).  scale = exp(+/-weight)
# is precomputed in the wrapper, so the body is a single fused VPU op.
#   direct : y = (x - bias) * scale
#   inverse: y = x * scale + bias
# ---------------------------------------------------------------------------
def _actnorm_direct_kernel(x_ref, scale_ref, bias_ref, y_ref):
    y_ref[...] = (x_ref[...] - bias_ref[...]) * scale_ref[...]


def _actnorm_inverse_kernel(x_ref, scale_ref, bias_ref, y_ref):
    y_ref[...] = x_ref[...] * scale_ref[...] + bias_ref[...]


# ---------------------------------------------------------------------------
# Wrappers
# ---------------------------------------------------------------------------
def actnorm_data_init(x):
    """Returns (weight, bias), each (D,), computed from x like the PyTorch init."""
    B, D = x.shape
    if B < 2:
        raise ValueError("ActNorm data-dependent init requires batch size >= 2 (ddof=1 std).")
    cap = _vmem_capacity_bytes()
    tb = _choose_batch_tile(B, D, cap // 4)
    num_tiles = pl.cdiv(B, tb)

    kernel = functools.partial(_actnorm_init_kernel, n_rows=B, tb=tb)
    w, b = pl.pallas_call(
        kernel,
        out_shape=(
            jax.ShapeDtypeStruct((1, D), jnp.float32),
            jax.ShapeDtypeStruct((1, D), jnp.float32),
        ),
        grid=(num_tiles,),
        in_specs=[pl.BlockSpec((tb, D), lambda i: (i, 0))],
        out_specs=(
            pl.BlockSpec((1, D), lambda i: (0, 0)),
            pl.BlockSpec((1, D), lambda i: (0, 0)),
        ),
        scratch_shapes=[
            pltpu.VMEM((1, D), jnp.float32),   # shift (first row)
            pltpu.VMEM((1, D), jnp.float32),   # running sum of (x - shift)
            pltpu.VMEM((1, D), jnp.float32),   # running sum of (x - shift)^2
        ],
        compiler_params=pltpu.CompilerParams(
            dimension_semantics=("arbitrary",),
            vmem_limit_bytes=cap // 2),
    )(x)
    return w.reshape(D), b.reshape(D)


def actnorm_transform(x, weight, bias, mode="direct"):
    B, D = x.shape
    direct = mode == "direct"

    # Hoist transcendentals and the constant per-row logdet out of the kernel.
    if direct:
        scale = jnp.exp(weight)
        logdet_val = jnp.sum(weight)
    else:
        scale = jnp.exp(-weight)
        logdet_val = -jnp.sum(weight)
    # .sum(-1, keepdim=True).unsqueeze(0).repeat(B, 1) -> (B, 1), plain XLA
    # (a lane-width-1 kernel output would be all masked partial stores).
    logdet = jnp.broadcast_to(logdet_val.reshape(1, 1), (B, 1)).astype(jnp.float32)

    scale_row = scale.reshape(1, D)
    bias_row = bias.reshape(1, D)

    # Lane-dense layout plumbing: view (B, D) as (B/m, m*D) when possible.
    remap = _lane_dense_remap(B, D)
    if remap is not None:
        m, L = remap
        xk = x.reshape(B // m, L)                # free row-major reshape
        scale_row = jnp.tile(scale_row, (1, m))  # column c holds feature c % D
        bias_row = jnp.tile(bias_row, (1, m))
        Bk, Dk = B // m, L
    else:
        xk = x
        Bk, Dk = B, D

    cap = _vmem_capacity_bytes()
    tb = _choose_batch_tile(Bk, Dk, cap // 4)
    num_tiles = pl.cdiv(Bk, tb)                  # ragged last block: no pad / slice

    kernel = _actnorm_direct_kernel if direct else _actnorm_inverse_kernel
    y = pl.pallas_call(
        kernel,
        out_shape=jax.ShapeDtypeStruct((Bk, Dk), jnp.float32),
        grid=(num_tiles,),
        in_specs=[
            pl.BlockSpec((tb, Dk), lambda i: (i, 0)),   # x tile, pipelined
            pl.BlockSpec((1, Dk), lambda i: (0, 0)),    # scale, resident
            pl.BlockSpec((1, Dk), lambda i: (0, 0)),    # bias, resident
        ],
        out_specs=pl.BlockSpec((tb, Dk), lambda i: (i, 0)),
        compiler_params=pltpu.CompilerParams(
            dimension_semantics=("parallel",),          # shard batch tiles on v7x megacore
            vmem_limit_bytes=cap // 2),
        cost_estimate=pl.CostEstimate(
            flops=2 * Bk * Dk, transcendentals=0,
            bytes_accessed=8 * Bk * Dk + 8 * Dk),
    )(xk, scale_row, bias_row)

    if remap is not None:
        y = y.reshape(B, D)
    return y, logdet


class ActNorm:
    """JAX/Pallas mirror of the PyTorch ActNorm module (forward pass)."""

    def __init__(self, num_inputs):
        # Deterministic __init__ parameters (same as nn.Parameter(ones/zeros)).
        self.weight = jnp.ones((num_inputs,), dtype=jnp.float32)
        self.bias = jnp.zeros((num_inputs,), dtype=jnp.float32)
        # Host-side Python state, same semantics as the PyTorch module; under
        # jit/scan the data-dependent init will not re-trigger per trace.
        self.initialized = False

    def __call__(self, inputs, cond_inputs=None, mode="direct"):
        if not self.initialized:
            self.weight, self.bias = actnorm_data_init(inputs)
            self.initialized = True
        return actnorm_transform(inputs, self.weight, self.bias, mode=mode)


if __name__ == "__main__":
    B, D = 8, 32
    key = jax.random.PRNGKey(0)
    x = jax.random.normal(key, (B, D), dtype=jnp.float32)

    actnorm = ActNorm(D)
    y, logdet = actnorm(x, mode="direct")
    y = jax.block_until_ready(y)
    logdet = jax.block_until_ready(logdet)

    # Pure-JAX reference for correctness checking.
    ref_std = jnp.std(x, axis=0, ddof=1)
    ref_w = jnp.log(1.0 / (ref_std + 1e-12))
    ref_b = jnp.mean(x, axis=0)
    ref_y = (x - ref_b[None, :]) * jnp.exp(ref_w)[None, :]
    ref_ld = jnp.broadcast_to(jnp.sum(ref_w)[None, None], (B, 1))

    assert y.shape == (B, D) and logdet.shape == (B, 1)
    assert jnp.allclose(actnorm.weight, ref_w, atol=1e-5, rtol=1e-5)
    assert jnp.allclose(actnorm.bias, ref_b, atol=1e-5, rtol=1e-5)
    assert jnp.allclose(y, ref_y, atol=1e-5, rtol=1e-5)
    assert jnp.allclose(logdet, ref_ld, atol=1e-5, rtol=1e-5)

    # Inverse ("un-direct") mode round trip.
    x_rec, logdet_inv = actnorm(y, mode="inverse")
    x_rec = jax.block_until_ready(x_rec)
    assert jnp.allclose(x_rec, x, atol=1e-4, rtol=1e-4)
    assert jnp.allclose(logdet_inv, -ref_ld, atol=1e-5, rtol=1e-5)

    # Also exercise a batch that does not divide the tile / lane remap
    # (ragged last block path, no pad/slice copies).
    B2 = 50
    x2 = jax.random.normal(jax.random.PRNGKey(1), (B2, D), dtype=jnp.float32)
    y2, ld2 = actnorm_transform(x2, actnorm.weight, actnorm.bias, mode="direct")
    y2 = jax.block_until_ready(y2)
    ref_y2 = (x2 - actnorm.bias[None, :]) * jnp.exp(actnorm.weight)[None, :]
    assert jnp.allclose(y2, ref_y2, atol=1e-5, rtol=1e-5)
    assert ld2.shape == (B2, 1)

    print("KERNEL_OK")
</pallas_src>

<mosaic_0001>
module attributes {stable_mosaic.version = 11 : i64} {
  func.func @_actnorm_init_kernel(%arg0: i32, %arg1: memref<8x32xf32, #tpu.memory_space<vmem>>, %arg2: memref<1x32xf32, #tpu.memory_space<vmem>>, %arg3: memref<1x32xf32, #tpu.memory_space<vmem>>, %arg4: memref<1x32xf32, #tpu.memory_space<vmem>>, %arg5: memref<1x32xf32, #tpu.memory_space<vmem>>, %arg6: memref<1x32xf32, #tpu.memory_space<vmem>>) attributes {dimension_semantics = [#tpu.dimension_semantics<arbitrary>], iteration_bounds = array<i64: 1>, scalar_prefetch = 0 : i64, scratch_operands = 3 : i64, tpu.core_type = #tpu.core_type<tc>, window_params = [{transform_indices = @transform_0, window_bounds = array<i64: 8, 32>}, {pipeline_mode = #tpu.pipeline_mode<synchronous>, transform_indices = @transform_1, window_bounds = array<i64: 1, 32>}, {pipeline_mode = #tpu.pipeline_mode<synchronous>, transform_indices = @transform_2, window_bounds = array<i64: 1, 32>}]} {
    %c0 = arith.constant 0 : index
    %c0_0 = arith.constant 0 : index
    %0 = vector.load %arg1[%c0, %c0_0] : memref<8x32xf32, #tpu.memory_space<vmem>>, vector<8x32xf32>
    %c0_i32 = arith.constant 0 : i32
    %1 = arith.cmpi eq, %arg0, %c0_i32 : i32
    %2 = arith.extui %1 : i1 to i32
    %c0_i32_1 = arith.constant 0 : i32
    %3 = arith.cmpi ne, %2, %c0_i32_1 : i32
    scf.if %3 {
      %29 = vector.extract_strided_slice %0 {offsets = [0, 0], sizes = [1, 32], strides = [1, 1]} : vector<8x32xf32> to vector<1x32xf32>
      %c0_17 = arith.constant 0 : index
      %c0_18 = arith.constant 0 : index
      %30 = vector.load %arg4[%c0_17, %c0_18] : memref<1x32xf32, #tpu.memory_space<vmem>>, vector<1x32xf32>
      tpu.vector_store %arg4[%c0_17, %c0_18], %29 {strides = array<i32>} : memref<1x32xf32, #tpu.memory_space<vmem>>, vector<1x32xf32>,
      %cst_19 = arith.constant 0.000000e+00 : f32
      %31 = vector.broadcast %cst_19 : f32 to vector<1x32xf32>
      %c0_20 = arith.constant 0 : index
      %c0_21 = arith.constant 0 : index
      %32 = vector.load %arg5[%c0_20, %c0_21] : memref<1x32xf32, #tpu.memory_space<vmem>>, vector<1x32xf32>
      tpu.vector_store %arg5[%c0_20, %c0_21], %31 {strides = array<i32>} : memref<1x32xf32, #tpu.memory_space<vmem>>, vector<1x32xf32>,
      %cst_22 = arith.constant 0.000000e+00 : f32
      %33 = vector.broadcast %cst_22 : f32 to vector<1x32xf32>
      %c0_23 = arith.constant 0 : index
      %c0_24 = arith.constant 0 : index
      %34 = vector.load %arg6[%c0_23, %c0_24] : memref<1x32xf32, #tpu.memory_space<vmem>>, vector<1x32xf32>
      tpu.vector_store %arg6[%c0_23, %c0_24], %33 {strides = array<i32>} : memref<1x32xf32, #tpu.memory_space<vmem>>, vector<1x32xf32>,
    } else {
    }
    %4 = tpu.iota {dimensions = array<i32: 0>} : vector<8x32xi32>
    %c8_i32 = arith.constant 8 : i32
    %5 = arith.muli %arg0, %c8_i32 : i32
    %6 = vector.broadcast %5 : i32 to vector<8x32xi32>
    %7 = arith.addi %4, %6 : vector<8x32xi32>
    %c8_i32_2 = arith.constant 8 : i32
    %8 = vector.broadcast %c8_i32_2 : i32 to vector<8x32xi32>
    %9 = arith.cmpi slt, %7, %8 : vector<8x32xi32>
    %c0_3 = arith.constant 0 : index
    %c0_4 = arith.constant 0 : index
    %10 = vector.load %arg4[%c0_3, %c0_4] : memref<1x32xf32, #tpu.memory_space<vmem>>, vector<1x32xf32>
    %11 = vector.broadcast %10 : vector<1x32xf32> to vector<8x32xf32>
    %12 = arith.subf %0, %11 : vector<8x32xf32>
    %cst = arith.constant 0.000000e+00 : f32
    %13 = vector.broadcast %cst : f32 to vector<8x32xf32>
    %14 = arith.select %9, %12, %13 : vector<8x32xi1>, vector<8x32xf32>
    %c0_5 = arith.constant 0 : index
    %c0_6 = arith.constant 0 : index
    %15 = vector.load %arg5[%c0_5, %c0_6] : memref<1x32xf32, #tpu.memory_space<vmem>>, vector<1x32xf32>
    %cst_7 = arith.constant dense<0.000000e+00> : vector<32xf32>
    %16 = vector.multi_reduction <add>, %14, %cst_7 [0] : vector<8x32xf32> to vector<32xf32>
    %17 = vector.shape_cast %16 : vector<32xf32> to vector<1x32xf32>
    %18 = arith.addf %15, %17 : vector<1x32xf32>
    %c0_8 = arith.constant 0 : index
    %c0_9 = arith.constant 0 : index
    %19 = vector.load %arg5[%c0_8, %c0_9] : memref<1x32xf32, #tpu.memory_space<vmem>>, vector<1x32xf32>
    tpu.vector_store %arg5[%c0_8, %c0_9], %18 {strides = array<i32>} : memref<1x32xf32, #tpu.memory_space<vmem>>, vector<1x32xf32>,
    %c0_10 = arith.constant 0 : index
    %c0_11 = arith.constant 0 : index
    %20 = vector.load %arg6[%c0_10, %c0_11] : memref<1x32xf32, #tpu.memory_space<vmem>>, vector<1x32xf32>
    %21 = arith.mulf %14, %14 : vector<8x32xf32>
    %cst_12 = arith.constant dense<0.000000e+00> : vector<32xf32>
    %22 = vector.multi_reduction <add>, %21, %cst_12 [0] : vector<8x32xf32> to vector<32xf32>
    %23 = vector.shape_cast %22 : vector<32xf32> to vector<1x32xf32>
    %24 = arith.addf %20, %23 : vector<1x32xf32>
    %c0_13 = arith.constant 0 : index
    %c0_14 = arith.constant 0 : index
    %25 = vector.load %arg6[%c0_13, %c0_14] : memref<1x32xf32, #tpu.memory_space<vmem>>, vector<1x32xf32>
    tpu.vector_store %arg6[%c0_13, %c0_14], %24 {strides = array<i32>} : memref<1x32xf32, #tpu.memory_space<vmem>>, vector<1x32xf32>,
    %c0_i32_15 = arith.constant 0 : i32
    %26 = arith.cmpi eq, %arg0, %c0_i32_15 : i32
    %27 = arith.extui %26 : i1 to i32
    %c0_i32_16 = arith.constant 0 : i32
    %28 = arith.cmpi ne, %27, %c0_i32_16 : i32
    scf.if %28 {
      %c0_17 = arith.constant 0 : index
      %c0_18 = arith.constant 0 : index
      %29 = vector.load %arg5[%c0_17, %c0_18] : memref<1x32xf32, #tpu.memory_space<vmem>>, vector<1x32xf32>
      %cst_19 = arith.constant 8.000000e+00 : f32
      %30 = vector.broadcast %cst_19 : f32 to vector<1x32xf32>
      %31 = arith.divf %29, %30 : vector<1x32xf32>
      %c0_20 = arith.constant 0 : index
      %c0_21 = arith.constant 0 : index
      %32 = vector.load %arg6[%c0_20, %c0_21] : memref<1x32xf32, #tpu.memory_space<vmem>>, vector<1x32xf32>
      %cst_22 = arith.constant 8.000000e+00 : f32
      %33 = vector.broadcast %cst_22 : f32 to vector<1x32xf32>
      %34 = arith.mulf %33, %31 : vector<1x32xf32>
      %35 = arith.mulf %34, %31 : vector<1x32xf32>
      %36 = arith.subf %32, %35 : vector<1x32xf32>
      %cst_23 = arith.constant 8.000000e+00 : f32
      %cst_24 = arith.constant 1.000000e+00 : f32
      %37 = arith.subf %cst_23, %cst_24 : f32
      %38 = vector.broadcast %37 : f32 to vector<1x32xf32>
      %39 = arith.divf %36, %38 : vector<1x32xf32>
      %cst_25 = arith.constant 0.000000e+00 : f32
      %40 = vector.broadcast %cst_25 : f32 to vector<1x32xf32>
      %41 = arith.maximumf %39, %40 : vector<1x32xf32>
      %42 = math.sqrt %41 : vector<1x32xf32>
      %cst_26 = arith.constant 9.99999996E-13 : f32
      %43 = vector.broadcast %cst_26 : f32 to vector<1x32xf32>
      %44 = arith.addf %42, %43 : vector<1x32xf32>
      %cst_27 = arith.constant 1.000000e+00 : f32
      %45 = vector.broadcast %cst_27 : f32 to vector<1x32xf32>
      %46 = arith.divf %45, %44 : vector<1x32xf32>
      %47 = math.log %46 : vector<1x32xf32>
      %c0_28 = arith.constant 0 : index
      %c0_29 = arith.constant 0 : index
      %48 = vector.load %arg2[%c0_28, %c0_29] : memref<1x32xf32, #tpu.memory_space<vmem>>, vector<1x32xf32>
      tpu.vector_store %arg2[%c0_28, %c0_29], %47 {strides = array<i32>} : memref<1x32xf32, #tpu.memory_space<vmem>>, vector<1x32xf32>,
      %c0_30 = arith.constant 0 : index
      %c0_31 = arith.constant 0 : index
      %49 = vector.load %arg4[%c0_30, %c0_31] : memref<1x32xf32, #tpu.memory_space<vmem>>, vector<1x32xf32>
      %50 = arith.addf %31, %49 : vector<1x32xf32>
      %c0_32 = arith.constant 0 : index
      %c0_33 = arith.constant 0 : index
      %51 = vector.load %arg3[%c0_32, %c0_33] : memref<1x32xf32, #tpu.memory_space<vmem>>, vector<1x32xf32>
      tpu.vector_store %arg3[%c0_32, %c0_33], %50 {strides = array<i32>} : memref<1x32xf32, #tpu.memory_space<vmem>>, vector<1x32xf32>,
    } else {
    }
    return
  }
  func.func @transform_0(%arg0: i32) -> (i32, i32) {
    %c0_i32 = arith.constant 0 : i32
    %c0_i32_0 = arith.constant 0 : i32
    return %arg0, %c0_i32 : i32, i32
  }
  func.func @transform_1(%arg0: i32) -> (i32, i32) {
    %c0_i32 = arith.constant 0 : i32
    %c0_i32_0 = arith.constant 0 : i32
    %c0_i32_1 = arith.constant 0 : i32
    return %c0_i32, %c0_i32_0 : i32, i32
  }
  func.func @transform_2(%arg0: i32) -> (i32, i32) {
    %c0_i32 = arith.constant 0 : i32
    %c0_i32_0 = arith.constant 0 : i32
    %c0_i32_1 = arith.constant 0 : i32
    return %c0_i32, %c0_i32_0 : i32, i32
  }
}

</mosaic_0001>

<bundles_post_ra>
// kernel: tpu_custom_call.1
= control target key start
LH: loop header
LB: loop body
LE: loop exit
PB: predicated region body
PF: predicated region fallthrough
CT: control target
= control target key end

     0   :  { %8 = vsyncpa [#allocation6], 0  ;;  %s241_s0 = inlined_call_operand.hbm [shape: f32[8,32], index: 0, kind: input, shape index: {}]   ;;  %s242_s1 = inlined_call_operand.hbm [shape: f32[1,32], index: 1, kind: output, shape index: {0}]   ;;  %s243_s2 = inlined_call_operand.hbm [shape: f32[1,32], index: 2, kind: output, shape index: {1}]  }
   0x1   :  { %9 = vsyncpa [#allocation7], 0 }
   0x2   :  { %10 = vsyncpa [#allocation10], 0  ;;  %s206_s9 = smov [#allocation5]  }
   0x3   :  { %s17_s10 = sshll.u32 %s206_s9, 4  ;;  %s18_s10 = int_to_ptr.vmem [resolvable:$true] %s17_s10 }
   0x4   :  { %s148_s11 = scalar_lea.vmem %s18_s10, 128  ;;  %p153_p1 = scmp.lt.s32.totalorder %s18_s10, %s18_s10 }
   0x5   :  { %p149_p0 = scmp.ne.s32.totalorder %s18_s10, %s148_s11  ;;  %p154_p2 = scmp.lt.s32.totalorder %s148_s11, %s148_s11 }
   0x7   :  { %p155_p3 = por %p154_p2, %p153_p1 }
   0x9   :  { %p156_p4 = pnand %p155_p3, %p149_p0 }
   0xb   :  { %159 = shalt.err (!%p156_p4)
}
   0xc   :  { %20 = dma.hbm_to_vmem [thread:$0]  %s241_s0, 128, %s18_s10, [#allocation6]  }
   0xd   :  { %200 = dma.done.wait [#allocation6], 128  }
   0xe   :  { %201 = vsyncadd [#allocation6], 4294967168  ;;  %vm29_vm0 = vcmask 253952   ;;  %v207_v0 = vmov 0.0   ;;  %v24_v1 = vld [vmem:[#allocation5] sm:$0xff]  ;;  %vm49_vm1 = vcmask 261120  }
   0xf   :  { %31 = vst.msk [vmem:[#allocation3] sm:$0x1] %vm29_vm0, %v207_v0  ;;  %32 = vst.msk [vmem:[#allocation4] sm:$0x1] %vm29_vm0, %v207_v0  ;;  %s208_s0 = smov [#allocation9]  }
  0x10   :  { %30 = vst.msk [vmem:[#allocation2] sm:$0x1] %vm29_vm0, %v24_v1  ;;  %s116_s14 = sshll.u32 %s208_s0, 4  ;;  %s117_s14 = int_to_ptr.vmem [resolvable:$true] %s116_s14 }
  0x11   :  { %s160_s15 = scalar_lea.vmem %s117_s14, 16  ;;  %s164_s16 = scalar_lea.vmem %s117_s14, 32 }
  0x12   :  { %p161_p5 = scmp.ne.s32.totalorder %s117_s14, %s160_s15  ;;  %p165_p6 = scmp.lt.s32.totalorder %s117_s14, %s117_s14 }
  0x13   :  { %p166_p7 = scmp.lt.s32.totalorder %s164_s16, %s160_s15 }
  0x15   :  { %p167_p8 = por %p166_p7, %p165_p6 }
  0x16   :  { %v48_v16 = vld [vmem:[#allocation3] sm:$0x1]  ;;  %v60_v19 = vld [vmem:[#allocation4] sm:$0x1] }
  0x17   :  { %v129_v2 = vld [vmem:[#allocation2] ss:$0 sm:$0xff]  ;;  %p168_p9 = pnand %p167_p8, %p161_p5 }
  0x18   :  { %v46_v3 = vsub.f32 %v24_v1, %v129_v2  ;;  %v97_v25 = vld [vmem:[#allocation2] sm:$0x1] }
  0x1a   :  { %v50_v4 = vsel %vm49_vm1, %v46_v3, 0.0  ;;  %v61_v5 = vmul.f32 %v46_v3, %v46_v3 }
  0x1b   :  { %v51_v6 = vrot.slane %v50_v4, 4 }
  0x1c   :  { %v62_v7 = vsel %vm49_vm1, %v61_v5, 0.0 }
  0x1d   :  { %v52_v8 = vadd.f32 %v51_v6, %v50_v4  ;;  %v63_v9 = vrot.slane %v62_v7, 4 }
  0x1f   :  { %v53_v10 = vrot.slane %v52_v8, 2  ;;  %v64_v11 = vadd.f32 %v63_v9, %v62_v7 }
  0x21   :  { %v54_v12 = vadd.f32 %v53_v10, %v52_v8  ;;  %v65_v13 = vrot.slane %v64_v11, 2 }
  0x23   :  { %v55_v14 = vrot.slane %v54_v12, 1  ;;  %v66_v15 = vadd.f32 %v65_v13, %v64_v11 }
  0x25   :  { %v56_v17 = vadd.f32 %v55_v14, %v54_v12  ;;  %v67_v18 = vrot.slane %v66_v15, 1 }
  0x27   :  { %v57_v20 = vadd.f32 %v56_v17, %v48_v16  ;;  %v68_v21 = vadd.f32 %v67_v18, %v66_v15 }
  0x29   :  { %59 = vst.msk [vmem:[#allocation3] sm:$0x1] %vm29_vm0, %v57_v20  ;;  %v69_v22 = vadd.f32 %v68_v21, %v60_v19 }
  0x2b   :  { %70 = vst.msk [vmem:[#allocation4] sm:$0x1] %vm29_vm0, %v69_v22 }
  0x30   :  { %v74_v23 = vld [vmem:[#allocation3] sm:$0x1] }
  0x31   :  { %v76_v24 = vmul.f32 0.125, %v74_v23 }
  0x32   :  { %v77_v29 = vld [vmem:[#allocation4] sm:$0x1] }
  0x33   :  { %v78_v26 = vmul.f32 8.0, %v76_v24  ;;  %v98_v27 = vadd.f32 %v97_v25, %v76_v24 }
  0x35   :  { %v79_v28 = vmul.f32 %v78_v26, %v76_v24  ;;  %99 = vst.msk [vmem:[#allocation9] sm:$0x1] %vm29_vm0, %v98_v27 }
  0x36   :  { %171 = shalt.err (!%p168_p9)
}
  0x37   :  { %119 = dma.vmem_to_hbm [thread:$0]  %s117_s14, 16, %s243_s2, [#allocation10]   ;;  %v80_v30 = vsub.f32 %v77_v29, %v79_v28 }
  0x38   :  { %s209_s19 = smov [#allocation8]  }
  0x39   :  { %v82_v31 = vmul.f32 0.14285715, %v80_v30  ;;  %s106_s20 = sshll.u32 %s209_s19, 4  ;;  %s107_s20 = int_to_ptr.vmem [resolvable:$true] %s106_s20 }
  0x3a   :  { %s180_s2 = scalar_lea.vmem %s107_s20, 16  ;;  %s184_s21 = scalar_lea.vmem %s107_s20, 32 }
  0x3b   :  { %v83_v32 = vmax.f32 %v82_v31, 0.0  ;;  %p181_p10 = scmp.ne.s32.totalorder %s107_s20, %s180_s2  ;;  %p185_p11 = scmp.lt.s32.totalorder %s107_s20, %s107_s20 }
  0x3c   :  { %p186_p12 = scmp.lt.s32.totalorder %s184_s21, %s180_s2 }
  0x3d   :  { %134 = vrsqrt.f32 %v83_v32  ;;  %vm86_vm2 = vcmp.eq.f32.partialorder %v83_v32, inf  ;;  %v89_v35 = vand.u32 2147483648, %v83_v32  ;;  %vm88_vm3 = vcmp.eq.f32.partialorder %v83_v32, 0.0 }
  0x3e   :  { %p187_p13 = por %p186_p12, %p185_p11 }
  0x40   :  { %p188_p0 = pnand %p187_p13, %p181_p10 }
  0x4a   :  { %v135_v33 = vpop.eup %134 }
  0x4b   :  { %v85_v34 = vmul.f32 %v135_v33, %v83_v32 }
  0x4d   :  { %v87_v36 = vsel %vm86_vm2, %v83_v32, %v85_v34 }
  0x4e   :  { %v90_v37 = vsel %vm88_vm3, %v89_v35, %v87_v36 }
  0x4f   :  { %v91_v38 = vadd.f32 1e-12, %v90_v37 }
  0x51   :  { %136 = vrcp.f32 %v91_v38 }
  0x5e   :  { %v137_v39 = vpop.eup %136 }
  0x5f   :  { %138 = vlog2.f32 %v137_v39 }
  0x6c   :  { %v139_v40 = vpop.eup %138 }
  0x6d   :  { %v95_v41 = vmul.f32 0.6931472, %v139_v40 }
  0x6f   :  { %96 = vst.msk [vmem:[#allocation8] sm:$0x1] %vm29_vm0, %v95_v41 }
  0x70   :  { %191 = shalt.err (!%p188_p0)
}
  0x71   :  { %109 = dma.vmem_to_hbm [thread:$0]  %s107_s20, 16, %s242_s1, [#allocation7]  }
  0x72   :  { %202 = dma.done.wait [#allocation7], 16  }
  0x73   :  { %203 = vsyncadd [#allocation7], 4294967280 }
  0x74   :  { %204 = dma.done.wait [#allocation10], 16  }
  0x75   :  { %205 = vsyncadd [#allocation10], 4294967280 }
  0x76   :  { %126 = vsyncpa [#allocation6], 1 }
  0x77   :  { %127 = vsyncpa [#allocation7], 1 }
  0x78   :  { %128 = vsyncpa [#allocation10], 1 }

</bundles_post_ra>
